<compile_context>
chip_gen: v5e
topology: v5e:2x2
jax: 0.10.0
libtpu: 0.0.40
codegen_flags: <defaults>
</compile_context>

<pallas_src>
import functools

import jax
import jax.numpy as jnp
import numpy as np
from jax import lax
from jax.experimental import pallas as pl
from jax.experimental.pallas import tpu as pltpu

EPS = 1e-5  # nn.InstanceNorm2d default


@functools.lru_cache(maxsize=None)
def _roll_matches_jnp_roll():
    """One-time probe of pltpu.roll's rotation direction.

    True  -> pltpu.roll(x, s)[l] == x[(l - s) % L]  (jnp.roll convention)
    False -> pltpu.roll(x, s)[l] == x[(l + s) % L]
    The reflection border fix stays correct under either convention.
    """
    def probe(x_ref, o_ref):
        o_ref[...] = pltpu.roll(x_ref[...], 1, axis=1)

    x = jnp.arange(8 * 128, dtype=jnp.float32).reshape(8, 128)
    y = pl.pallas_call(
        probe, out_shape=jax.ShapeDtypeStruct((8, 128), jnp.float32))(x)
    return bool(jnp.array_equal(y, jnp.roll(x, 1, axis=1)))


def _vmem_limit_bytes():
    # Generation-aware scoped-VMEM limit: ~3/4 of physical VMEM
    # (v5e/v6e: 128 MiB -> 96 MiB, v7x: 64 MiB -> 48 MiB), clamped to
    # [32 MiB, 100 MiB]; conservative 64 MiB if the query is unavailable.
    try:
        phys = int(pltpu.get_tpu_info().vmem_capacity_bytes)
        return max(32 * 1024 * 1024, min(100 * 1024 * 1024, (phys * 3) // 4))
    except Exception:
        return 64 * 1024 * 1024


def _ins_resblock_kernel(x_ref, w1_ref, w2_ref, out_ref, pad_ref, *,
                         H, W, eps, roll_matches_jnp):
    # x_ref  : (1, C, M) f32   full-width flat input: lane = row*Wp + col,
    #                          cols [0, W) valid, cols W..W+1 zero filler
    # w*_ref : (C, 9*C)        conv taps folded into K, pre-transposed (MXU dtype)
    # out_ref: (1, C, M) f32   same full-width layout (junk cols dropped outside)
    # pad_ref: (C, PADW) f32   scratch reused for BOTH reflection pads
    #                          (flattened padded image: lane l = r*Wp + c)
    C = x_ref.shape[1]
    Hp, Wp = H + 2, W + 2
    M = H * Wp                       # full-width positions (2 junk cols per row)
    PADW = pad_ref.shape[1]          # >= Hp*Wp + 2 so every tap slice is in-bounds
    mxu_dtype = w1_ref.dtype

    taps = [dy * Wp + dx for dy in range(3) for dx in range(3)]

    lane = lax.broadcasted_iota(jnp.int32, (C, PADW), 1)
    pcol = lane % Wp
    prow = lane // Wp

    def shift_lanes(v, s):
        # result[:, l] = v[:, (l + s) % PADW]; only non-wrapping lanes are used.
        shift = ((-s) if roll_matches_jnp else s) % PADW
        return pltpu.roll(v, shift, axis=1)           # XLU lane rotate

    def reflect_fix(core):
        # Rebuild the ReflectionPad2d(1) border on the loaded padded image
        # (columns first, then rows, so the corners come out right).
        core = jnp.where(pcol == 0, shift_lanes(core, 2), core)            # col 0 <- col 2
        core = jnp.where(pcol == W + 1, shift_lanes(core, -2), core)       # col W+1 <- col W-1
        core = jnp.where(prow == 0, shift_lanes(core, 2 * Wp), core)       # row 0 <- row 2
        core = jnp.where(prow == Hp - 1, shift_lanes(core, -2 * Wp), core) # row Hp-1 <- row Hp-3
        return core

    def conv3x3(w_ref):
        padded = reflect_fix(pad_ref[...])                           # (C, PADW) f32
        # All 9 taps folded into the contraction dim: one K=9*C MXU matmul.
        # Conv bias is omitted on purpose: InstanceNorm's mean subtraction
        # cancels any per-channel constant exactly.
        patch = jnp.concatenate([padded[:, o:o + M] for o in taps], axis=0)
        return jnp.dot(w_ref[...], patch.astype(mxu_dtype),
                       preferred_element_type=jnp.float32)           # (C, M) f32

    valid = (lax.broadcasted_iota(jnp.int32, (C, M), 1) % Wp) < W    # mask junk cols
    npix = float(H * W)

    def inorm(acc):
        # Two-pass statistics (mean, then squared deviations): safe against
        # catastrophic cancellation of s2/n - mean^2.
        av = jnp.where(valid, acc, 0.0)
        mean = jnp.sum(av, axis=1, keepdims=True) / npix
        dev = jnp.where(valid, acc - mean, 0.0)
        var = jnp.sum(dev * dev, axis=1, keepdims=True) / npix
        return (acc - mean) * lax.rsqrt(var + eps)

    # ---- reflection pad #1: one lane-dense bulk store of the full-width input ----
    pad_ref[...] = jnp.zeros(pad_ref.shape, pad_ref.dtype)  # keep junk lanes finite
    pad_ref[:, Wp + 1:Wp + 1 + M] = x_ref[0]

    # ---- conv1 -> instance norm -> ReLU ----
    y1 = jnp.maximum(inorm(conv3x3(w1_ref)), 0.0)                    # (C, M) f32

    # ---- reflection pad #2: reuse scratch, one bulk store (edges fixed at read) ----
    pad_ref[:, Wp + 1:Wp + 1 + M] = y1

    # ---- conv2 -> instance norm -> residual add (full-width, lane aligned) ----
    out_ref[0] = inorm(conv3x3(w2_ref)) + x_ref[0]


def ins_res_block(x_nchw, w1_hwio, b1, w2_hwio, b2, *,
                  mxu_dtype=jnp.bfloat16, eps=EPS):
    """x_nchw: (N, C, H, W) f32; conv weights in HWIO (3, 3, Cin, Cout).

    b1/b2 are accepted for API parity with the PyTorch module but are not
    used: InstanceNorm2d's mean subtraction cancels per-channel biases.
    """
    N, C, H, W = x_nchw.shape
    assert w1_hwio.shape[-1] == C and w2_hwio.shape[-1] == C, \
        "residual add requires inplanes == planes"
    assert H >= 2 and W >= 2, "ReflectionPad2d(1) needs H, W >= 2"
    Hp, Wp = H + 2, W + 2
    M = H * Wp
    Cp = (C + 7) // 8 * 8                                # sublane-tile aligned channels
    PADW = ((Hp * Wp + 2) + 127) // 128 * 128            # padded-flat scratch lane width

    # Full-width flat input: 2 zero filler cols appended per row; free XLA
    # pad + reshape only (no transpose touches HBM).
    x_fw = jnp.pad(x_nchw.astype(jnp.float32),
                   ((0, 0), (0, Cp - C), (0, 0), (0, 2))).reshape(N, Cp, M)

    # Taps folded into K and pre-transposed: w_t[o, (dy*3+dx)*Cp + c] = w[dy,dx,c,o].
    def pack_w(w_hwio):
        w = jnp.pad(w_hwio.astype(jnp.float32),
                    ((0, 0), (0, 0), (0, Cp - C), (0, Cp - C)))
        return w.reshape(9 * Cp, Cp).T.astype(mxu_dtype)

    w1_t = pack_w(w1_hwio)
    w2_t = pack_w(w2_hwio)

    kernel = functools.partial(_ins_resblock_kernel, H=H, W=W, eps=eps,
                               roll_matches_jnp=_roll_matches_jnp_roll())

    # TODO(synk): at production sizes (e.g. 256ch, 64x64) the (9C, M) patch +
    # f32 temporaries exceed v7x's 64 MiB VMEM: chunk the patch/matmul over the
    # lane axis (or row-block H with a 2-row halo) on an extra "arbitrary" grid
    # axis, accumulating the norm stats in scratch and finalizing with pl.when,
    # while keeping the batch axis "parallel".
    # TODO(synk): for very small C/HW, process 2+ samples per grid step to
    # amortize the ~0.35us per-step pipeline overhead.
    out_fw = pl.pallas_call(
        kernel,
        out_shape=jax.ShapeDtypeStruct((N, Cp, M), jnp.float32),
        grid_spec=pltpu.PrefetchScalarGridSpec(
            num_scalar_prefetch=0,
            grid=(N,),
            in_specs=[
                pl.BlockSpec((1, Cp, M), lambda n: (n, 0, 0)),   # lane-dense input
                pl.BlockSpec((Cp, 9 * Cp), lambda n: (0, 0)),    # resident weights
                pl.BlockSpec((Cp, 9 * Cp), lambda n: (0, 0)),
            ],
            out_specs=pl.BlockSpec((1, Cp, M), lambda n: (n, 0, 0)),
            scratch_shapes=[pltpu.VMEM((Cp, PADW), jnp.float32)],
        ),
        compiler_params=pltpu.CompilerParams(
            dimension_semantics=("parallel",),   # batch shards across cores
            vmem_limit_bytes=_vmem_limit_bytes(),
        ),
    )(x_fw, w1_t, w2_t)

    # Compact full-width rows (Wp -> W) and drop padded channels: cheap XLA slice.
    return out_fw.reshape(N, Cp, H, Wp)[:, :C, :, :W]


def _reference(x_nchw, w1_hwio, b1, w2_hwio, b2):
    """Pure-JAX f32 reference mirroring the PyTorch module (biases included)."""
    x = jnp.transpose(x_nchw, (0, 2, 3, 1)).astype(jnp.float32)

    def conv(inp, w, b):
        p = jnp.pad(inp, ((0, 0), (1, 1), (1, 1), (0, 0)), mode="reflect")
        y = lax.conv_general_dilated(
            p, w, window_strides=(1, 1), padding="VALID",
            dimension_numbers=("NHWC", "HWIO", "NHWC"),
            precision=lax.Precision.HIGHEST)
        return y + b

    def inorm(y):
        m = jnp.mean(y, axis=(1, 2), keepdims=True)
        v = jnp.mean((y - m) ** 2, axis=(1, 2), keepdims=True)
        return (y - m) * lax.rsqrt(v + EPS)

    h = jnp.maximum(inorm(conv(x, w1_hwio, b1)), 0.0)
    o = inorm(conv(h, w2_hwio, b2)) + x
    return jnp.transpose(o, (0, 3, 1, 2))


if __name__ == "__main__":
    N, C, H, W = 2, 4, 16, 16  # inplanes == planes, stride=1, dropout=0.0

    key = jax.random.PRNGKey(0)
    kx, kw1, kb1, kw2, kb2 = jax.random.split(key, 5)

    x = jax.random.normal(kx, (N, C, H, W), dtype=jnp.float32)
    # gaussian_weights_init: conv weights ~ N(0, 0.02); biases small.
    w1 = 0.02 * jax.random.normal(kw1, (3, 3, C, C), dtype=jnp.float32)  # HWIO
    b1 = 0.01 * jax.random.normal(kb1, (C,), dtype=jnp.float32)
    w2 = 0.02 * jax.random.normal(kw2, (3, 3, C, C), dtype=jnp.float32)
    b2 = 0.01 * jax.random.normal(kb2, (C,), dtype=jnp.float32)

    ref = jax.block_until_ready(_reference(x, w1, b1, w2, b2))

    # Structural check (f32 MXU operands): validates padding / conv / norm /
    # residual wiring; tolerance leaves headroom for matmul precision modes.
    out_f32 = jax.block_until_ready(
        ins_res_block(x, w1, b1, w2, b2, mxu_dtype=jnp.float32))
    np.testing.assert_allclose(np.asarray(out_f32), np.asarray(ref),
                               rtol=1e-2, atol=1e-2)

    # Performance config (bf16 weights + patch on the MXU, f32 accumulation
    # and f32 pad scratch / norm math).
    out_bf16 = jax.block_until_ready(ins_res_block(x, w1, b1, w2, b2))
    np.testing.assert_allclose(np.asarray(out_bf16), np.asarray(ref),
                               rtol=0.0, atol=0.1)

    print("KERNEL_OK")
</pallas_src>

<mosaic_0001>
module attributes {stable_mosaic.version = 11 : i64} {
  func.func @probe(%arg0: memref<8x128xf32, #tpu.memory_space<vmem>>, %arg1: memref<8x128xf32, #tpu.memory_space<vmem>>) attributes {dimension_semantics = [], scalar_prefetch = 0 : i64, scratch_operands = 0 : i64, tpu.core_type = #tpu.core_type<tc>} {
    %c0 = arith.constant 0 : index
    %c0_0 = arith.constant 0 : index
    %0 = vector.load %arg0[%c0, %c0_0] : memref<8x128xf32, #tpu.memory_space<vmem>>, vector<8x128xf32>
    %c1_i32 = arith.constant 1 : i32
    %1 = tpu.dynamic_rotate %0 by %c1_i32 dim 1 : vector<8x128xf32>, i32 -> vector<8x128xf32>
    %c0_1 = arith.constant 0 : index
    %c0_2 = arith.constant 0 : index
    %2 = vector.load %arg1[%c0_1, %c0_2] : memref<8x128xf32, #tpu.memory_space<vmem>>, vector<8x128xf32>
    tpu.vector_store %arg1[%c0_1, %c0_2], %1 {strides = array<i32>} : memref<8x128xf32, #tpu.memory_space<vmem>>, vector<8x128xf32>,
    return
  }
}

</mosaic_0001>

<bundles_post_ra>
// kernel: tpu_custom_call.1
= control target key start
LH: loop header
LB: loop body
LE: loop exit
PB: predicated region body
PF: predicated region fallthrough
CT: control target
= control target key end

     0   :  { %6 = vsyncpa [#allocation3], 0  ;;  %s118_s0 = inlined_call_operand.hbm [shape: f32[8,128], index: 0, kind: input, shape index: {}]   ;;  %s119_s1 = inlined_call_operand.hbm [shape: f32[8,128], index: 1, kind: output, shape index: {}]  }
   0x1   :  { %7 = vsyncpa [#allocation4], 0  ;;  %s13_s8 = sshll.u32 %s118_s0, 4  ;;  %s99_s9 = smov [#allocation2]   ;;  %s14_s8 = int_to_ptr.hbm [resolvable:$true] %s13_s8 }
   0x2   :  { %s15_s10 = sshll.u32 %s99_s9, 4  ;;  %s16_s10 = int_to_ptr.vmem [resolvable:$true] %s15_s10 }
   0x3   :  { %18 = dma.hbm_to_vmem [thread:$0]  %s14_s8, 128, %s16_s10, [#allocation3]  }
   0x4   :  { %95 = dma.done.wait [#allocation3], 128  }
   0x5   :  { %96 = vsyncadd [#allocation3], 4294967168  ;;  %v23_v0 = vld [vmem:[#allocation2] sm:$0xff]  ;;  %s100_s11 = smov 1   ;;  %s101_s12 = smov [#allocation5]  }
   0x6   :  { %24 = vrot.lane.b32.xlu0 %v23_v0, %s100_s11  ;;  %s32_s13 = sshll.u32 %s101_s12, 4  ;;  %s34_s16 = sshll.u32 %s119_s1, 4  ;;  %s33_s13 = int_to_ptr.vmem [resolvable:$true] %s32_s13  ;;  %s35_s16 = int_to_ptr.hbm [resolvable:$true] %s34_s16 }
  0x78   :  { %v25_v1 = vpop.permute.xlu0 %24 }
  0x79   :  { %26 = vst [vmem:[#allocation5] sm:$0xff] %v25_v1 }
  0x7a   :  { %37 = dma.vmem_to_hbm [thread:$0]  %s33_s13, 128, %s35_s16, [#allocation4]  }
  0x7b   :  { %97 = dma.done.wait [#allocation4], 128  }
  0x7c   :  { %98 = vsyncadd [#allocation4], 4294967168 }
  0x7d   :  { %42 = vsyncpa [#allocation3], 1 }
  0x7e   :  { %43 = vsyncpa [#allocation4], 1 }

</bundles_post_ra>
